<compile_context>
chip_gen: v6e
topology: v6e:2x2x1
jax: 0.10.0
libtpu: 0.0.40
codegen_flags: <defaults>
</compile_context>

<pallas_src>
import jax
import jax.numpy as jnp
from jax.experimental import pallas as pl
from jax.experimental.pallas import tpu as pltpu


def _binfc_kernel(x_ref, w_ref, o_ref):
    """One (tm, tn) f32 output tile, accumulated in place over the K axis.

    x_ref: (tm, tk) bf16, w_ref: (tk, tn) bf16 (+/-1 values), o_ref: (tm, tn)
    f32.  The output BlockSpec is k-invariant, so o_ref stays resident in VMEM
    across the K grid axis and doubles as the accumulator (no scratch).
    """
    @pl.when(pl.program_id(2) == 0)
    def _():
        o_ref[...] = jnp.zeros_like(o_ref)

    o_ref[...] += jnp.dot(x_ref[...], w_ref[...],
                          preferred_element_type=jnp.float32)


def _round_up(v: int, m: int) -> int:
    return ((v + m - 1) // m) * m


def _pick_tile(size: int, max_tile: int, step: int):
    """Pick a tile (power-of-2 multiple of `step`, <= max_tile) minimizing the
    padding of `size`; ties broken in favor of the larger tile.  Returns
    (tile, padded_size) with padded_size a multiple of tile."""
    best_tile, best_padded = step, _round_up(size, step)
    c = step
    while c <= max_tile:
        padded = _round_up(size, c)
        if padded < best_padded or (padded == best_padded and c > best_tile):
            best_tile, best_padded = c, padded
        c *= 2
    return best_tile, best_padded


def bin_fc(x: jax.Array, weight: jax.Array, *, tm: int = 512, tn: int = 1024,
           tk: int = 1024) -> jax.Array:
    """BinFC forward: y = x @ sign(weight).

    x:      (B, Cin)   float32
    weight: (Cin, Cout) float32
    returns (B, Cout)  float32
    """
    B, Cin = x.shape
    Cin_w, Cout = weight.shape
    assert Cin == Cin_w, (Cin, Cin_w)

    # Divisor-aware tile / padding choice.  M is aligned to 16 (bf16 sublane
    # packing), K/N to 128 (lane width).  Double-buffered footprint at the
    # defaults (512x1024 bf16 x, 1024x1024 bf16 w, 512x1024 f32 out) is
    # ~10 MiB -> portable across v5e/v6e/v7x scoped-VMEM defaults.
    tm, Mp = _pick_tile(_round_up(B, 16), tm, 16)
    tk, Kp = _pick_tile(_round_up(Cin, 128), tk, 128)
    tn, Np = _pick_tile(_round_up(Cout, 128), tn, 128)

    # v7x megacore: if the problem collapsed to a single (M, N) tile but N is
    # large, split tn so at least one parallel grid axis has >=2 tiles.
    if Mp // tm == 1 and Np // tn == 1 and Np >= 256:
        cand = (Np // 2 // 128) * 128
        while cand >= 128 and Np % cand:
            cand -= 128
        if cand >= 128:
            tn = cand

    # Fold binarization + bf16 casts into the padding copies: +/-1 is exact in
    # bf16, and zero-padded x columns make the padded-K contribution exactly
    # zero regardless of the binarized padded W rows.  Padded output rows/cols
    # are sliced off below.
    x_bf = x.astype(jnp.bfloat16)
    w_bin = jnp.where(weight >= 0.0, 1.0, -1.0).astype(jnp.bfloat16)
    if (Mp, Kp) != (B, Cin):
        x_p = jnp.zeros((Mp, Kp), jnp.bfloat16).at[:B, :Cin].set(x_bf)
    else:
        x_p = x_bf
    if (Kp, Np) != (Cin, Cout):
        w_p = jnp.zeros((Kp, Np), jnp.bfloat16).at[:Cin, :Cout].set(w_bin)
    else:
        w_p = w_bin

    grid = (Mp // tm, Np // tn, Kp // tk)

    out = pl.pallas_call(
        _binfc_kernel,
        out_shape=jax.ShapeDtypeStruct((Mp, Np), jnp.float32),
        grid_spec=pltpu.PrefetchScalarGridSpec(
            num_scalar_prefetch=0,
            grid=grid,
            in_specs=[
                pl.BlockSpec((tm, tk), lambda i, j, k: (i, k)),
                pl.BlockSpec((tk, tn), lambda i, j, k: (k, j)),
            ],
            out_specs=pl.BlockSpec((tm, tn), lambda i, j, k: (i, j)),
        ),
        compiler_params=pltpu.CompilerParams(
            dimension_semantics=("parallel", "parallel", "arbitrary"),
        ),
    )(x_p, w_p)

    return out[:B, :Cout]


if __name__ == "__main__":
    key = jax.random.PRNGKey(0)
    kx, kw = jax.random.split(key)

    batch = 8
    in_channels = 32
    out_channels = 32

    # Parameter init mimicking torch uniform_(-1, 1).
    weight = jax.random.uniform(
        kw, (in_channels, out_channels), dtype=jnp.float32,
        minval=-1.0, maxval=1.0)
    x = jax.random.normal(kx, (batch, in_channels), dtype=jnp.float32)

    out = bin_fc(x, weight)
    jax.block_until_ready(out)
    assert out.shape == (batch, out_channels)

    # Reference: same binarization; x rounded to bf16 to mirror the kernel's
    # MXU input precision (each product is exact in f32, only accumulation
    # order differs -> tight tolerance holds).
    sign_w = jnp.where(weight >= 0.0, 1.0, -1.0).astype(jnp.float32)
    x_rounded = x.astype(jnp.bfloat16).astype(jnp.float32)
    ref = x_rounded @ sign_w
    assert jnp.allclose(out, ref, atol=1e-4, rtol=1e-4), (
        float(jnp.max(jnp.abs(out - ref))))

    # Loose sanity check vs. the pure-f32 math (bf16 rounding of x only).
    ref_f32 = x @ sign_w
    assert jnp.allclose(out, ref_f32, atol=5e-2, rtol=5e-2)

    print("KERNEL_OK")
</pallas_src>

<mosaic_0001>
module attributes {stable_mosaic.version = 11 : i64} {
  func.func @_binfc_kernel(%arg0: i32, %arg1: i32, %arg2: i32, %arg3: memref<16x128xbf16, #tpu.memory_space<vmem>>, %arg4: memref<128x128xbf16, #tpu.memory_space<vmem>>, %arg5: memref<16x128xf32, #tpu.memory_space<vmem>>) attributes {dimension_semantics = [#tpu.dimension_semantics<parallel>, #tpu.dimension_semantics<parallel>, #tpu.dimension_semantics<arbitrary>], iteration_bounds = array<i64: 1, 1, 1>, scalar_prefetch = 0 : i64, scratch_operands = 0 : i64, tpu.core_type = #tpu.core_type<tc>, window_params = [{transform_indices = @transform_0, window_bounds = array<i64: 16, 128>}, {transform_indices = @transform_1, window_bounds = array<i64: 128, 128>}, {transform_indices = @transform_2, window_bounds = array<i64: 16, 128>}]} {
    %c0_i32 = arith.constant 0 : i32
    %0 = arith.cmpi eq, %arg2, %c0_i32 : i32
    %1 = arith.extui %0 : i1 to i32
    %c0_i32_0 = arith.constant 0 : i32
    %2 = arith.cmpi ne, %1, %c0_i32_0 : i32
    scf.if %2 {
      %cst_8 = arith.constant 0.000000e+00 : f32
      %9 = vector.broadcast %cst_8 : f32 to vector<16x128xf32>
      %c0_9 = arith.constant 0 : index
      %c0_10 = arith.constant 0 : index
      %10 = vector.load %arg5[%c0_9, %c0_10] : memref<16x128xf32, #tpu.memory_space<vmem>>, vector<16x128xf32>
      tpu.vector_store %arg5[%c0_9, %c0_10], %9 {strides = array<i32>} : memref<16x128xf32, #tpu.memory_space<vmem>>, vector<16x128xf32>,
    } else {
    }
    %c0 = arith.constant 0 : index
    %c0_1 = arith.constant 0 : index
    %3 = vector.load %arg5[%c0, %c0_1] : memref<16x128xf32, #tpu.memory_space<vmem>>, vector<16x128xf32>
    %c0_2 = arith.constant 0 : index
    %c0_3 = arith.constant 0 : index
    %4 = vector.load %arg3[%c0_2, %c0_3] : memref<16x128xbf16, #tpu.memory_space<vmem>>, vector<16x128xbf16>
    %c0_4 = arith.constant 0 : index
    %c0_5 = arith.constant 0 : index
    %5 = vector.load %arg4[%c0_4, %c0_5] : memref<128x128xbf16, #tpu.memory_space<vmem>>, vector<128x128xbf16>
    %cst = arith.constant dense<0.000000e+00> : vector<16x128xf32>
    %6 = tpu.matmul %4, %5, %cst {dimension_numbers = #tpu.dot_dimension_numbers<[1], [0], [0], [1], [0, 0, 1, 1], [], []>} : vector<16x128xbf16>, vector<128x128xbf16>, vector<16x128xf32> -> vector<16x128xf32>
    %7 = arith.addf %3, %6 : vector<16x128xf32>
    %c0_6 = arith.constant 0 : index
    %c0_7 = arith.constant 0 : index
    %8 = vector.load %arg5[%c0_6, %c0_7] : memref<16x128xf32, #tpu.memory_space<vmem>>, vector<16x128xf32>
    tpu.vector_store %arg5[%c0_6, %c0_7], %7 {strides = array<i32>} : memref<16x128xf32, #tpu.memory_space<vmem>>, vector<16x128xf32>,
    return
  }
  func.func @transform_0(%arg0: i32, %arg1: i32, %arg2: i32) -> (i32, i32) {
    %c0_i32 = arith.constant 0 : i32
    return %arg0, %arg2 : i32, i32
  }
  func.func @transform_1(%arg0: i32, %arg1: i32, %arg2: i32) -> (i32, i32) {
    %c0_i32 = arith.constant 0 : i32
    return %arg2, %arg1 : i32, i32
  }
  func.func @transform_2(%arg0: i32, %arg1: i32, %arg2: i32) -> (i32, i32) {
    %c0_i32 = arith.constant 0 : i32
    return %arg0, %arg1 : i32, i32
  }
}

</mosaic_0001>

<bundles_post_ra>
// kernel: tpu_custom_call.1
= control target key start
LH: loop header
LB: loop body
LE: loop exit
PB: predicated region body
PF: predicated region fallthrough
CT: control target
= control target key end

     0   :  { %7 = vsyncpa [#allocation3], 0  ;;  %s339_s0 = inlined_call_operand.hbm [shape: bf16[16,128], index: 0, kind: input, shape index: {}]   ;;  %s340_s1 = inlined_call_operand.hbm [shape: bf16[128,128], index: 1, kind: input, shape index: {}]   ;;  %s341_s2 = inlined_call_operand.hbm [shape: f32[16,128], index: 2, kind: output, shape index: {}]  }
   0x1   :  { %8 = vsyncpa [#allocation6], 0 }
   0x2   :  { %9 = vsyncpa [#allocation4], 0  ;;  %s306_s9 = smov [#allocation2]  }
   0x3   :  { %s15_s10 = sshll.u32 %s306_s9, 4  ;;  %s16_s10 = int_to_ptr.vmem [resolvable:$true] %s15_s10 }
   0x4   :  { %s248_s11 = scalar_lea.vmem %s16_s10, 128  ;;  %p253_p1 = scmp.lt.s32.totalorder %s16_s10, %s16_s10 }
   0x5   :  { %p249_p0 = scmp.ne.s32.totalorder %s16_s10, %s248_s11  ;;  %p254_p2 = scmp.lt.s32.totalorder %s248_s11, %s248_s11 }
   0x7   :  { %p255_p3 = por %p254_p2, %p253_p1 }
   0x9   :  { %p256_p4 = pnand %p255_p3, %p249_p0 }
   0xb   :  { %259 = shalt.err (!%p256_p4)
}
   0xc   :  { %s307_s12 = smov 64   ;;  %s308_s13 = smov 4  }
   0xd   :  { %21 = dma.hbm_to_vmem [thread:$0]  %s339_s0, 128, %s16_s10, [#allocation3], %s307_s12, %s307_s12, %s308_s13  }
   0xe   :  { %s309_s16 = smov [#allocation5]  }
   0xf   :  { %s27_s17 = sshll.u32 %s309_s16, 4  ;;  %s28_s17 = int_to_ptr.vmem [resolvable:$true] %s27_s17 }
  0x10   :  { %s268_s18 = scalar_lea.vmem %s28_s17, 1024  ;;  %p273_p6 = scmp.lt.s32.totalorder %s28_s17, %s28_s17 }
  0x11   :  { %p269_p5 = scmp.ne.s32.totalorder %s28_s17, %s268_s18  ;;  %p274_p7 = scmp.lt.s32.totalorder %s268_s18, %s268_s18 }
  0x13   :  { %p275_p8 = por %p274_p7, %p273_p6 }
  0x15   :  { %p276_p9 = pnand %p275_p8, %p269_p5 }
  0x17   :  { %279 = shalt.err (!%p276_p9)
}
  0x18   :  { %33 = dma.hbm_to_vmem [thread:$0]  %s340_s1, 1024, %s28_s17, [#allocation6], %s307_s12, %s307_s12, %s308_s13  }
  0x19   :  { %300 = dma.done.wait [#allocation3], 128  }
  0x1a   :  { %301 = vsyncadd [#allocation3], 4294967168 }
  0x1b   :  { %302 = dma.done.wait [#allocation6], 1024  }
  0x1c   :  { %303 = vsyncadd [#allocation6], 4294966272  ;;  %v310_v0 = vmov 0.0   ;;  %vm311_vm0 = vmmov 0   ;;  %v231_v1 = vld [vmem:[#allocation5 + $0x38] sm:$0xff]   ;;  %v232_v2 = vld [vmem:[#allocation5 + $0x30] sm:$0xff]  }
  0x1d   :  { %202 = vmatprep.subr.bf16.mxu0 %v310_v0  ;;  %218 = vmatprep.mubr.msk.bf16.mxu0 %vm311_vm0, %v310_v0  ;;  %v233_v3 = vld [vmem:[#allocation5 + $0x28] sm:$0xff]   ;;  %v234_v4 = vld [vmem:[#allocation5 + $0x20] sm:$0xff]   ;;  %v235_v5 = vld [vmem:[#allocation5 + $0x18] sm:$0xff]   ;;  %s312_s0 = smov [#allocation7]  }
  0x1e   :  { %203 = vmatpush3.bf16.msra.mxu0 %v231_v1  ;;  %v236_v6 = vld [vmem:[#allocation5 + $0x10] sm:$0xff]   ;;  %v237_v7 = vld [vmem:[#allocation5 + $0x8] sm:$0xff]   ;;  %v238_v8 = vld [vmem:[#allocation5] sm:$0xff]   ;;  %s171_s1 = sshll.u32 %s312_s0, 4  ;;  %s172_s1 = int_to_ptr.vmem [resolvable:$true] %s171_s1 }
  0x1f   :  { %204 = vmatprep.subr.bf16.mxu0 %v310_v0  ;;  %v239_v9 = vld [vmem:[#allocation2] sm:$0xff]   ;;  %s280_s21 = scalar_lea.vmem %s172_s1, 256  ;;  %p285_p11 = scmp.lt.s32.totalorder %s172_s1, %s172_s1 }
  0x20   :  { %p281_p10 = scmp.ne.s32.totalorder %s172_s1, %s280_s21  ;;  %p286_p12 = scmp.lt.s32.totalorder %s280_s21, %s280_s21 }
  0x22   :  { %205 = vmatpush3.bf16.msra.mxu0 %v232_v2  ;;  %p287_p13 = por %p286_p12, %p285_p11 }
  0x23   :  { %206 = vmatprep.subr.bf16.mxu0 %v310_v0 }
  0x24   :  { %p288_p0 = pnand %p287_p13, %p281_p10 }
  0x26   :  { %207 = vmatpush3.bf16.msra.mxu0 %v233_v3 }
  0x27   :  { %208 = vmatprep.subr.bf16.mxu0 %v310_v0 }
  0x2a   :  { %209 = vmatpush3.bf16.msra.mxu0 %v234_v4 }
  0x2b   :  { %210 = vmatprep.subr.bf16.mxu0 %v310_v0 }
  0x2e   :  { %211 = vmatpush3.bf16.msra.mxu0 %v235_v5 }
  0x2f   :  { %212 = vmatprep.subr.bf16.mxu0 %v310_v0 }
  0x32   :  { %213 = vmatpush3.bf16.msra.mxu0 %v236_v6 }
  0x33   :  { %214 = vmatprep.subr.bf16.mxu0 %v310_v0 }
  0x36   :  { %215 = vmatpush3.bf16.msra.mxu0 %v237_v7 }
  0x37   :  { %216 = vmatprep.subr.bf16.mxu0 %v310_v0 }
  0x3a   :  { %217 = vmatpush3.bf16.msra.mxu0 %v238_v8 }
  0x3d   :  { %219 = vmatmul.mubr.bf16.vlgmr.msra.gmra.mxu0 %v239_v9 }
  0xfd   :  { %v155_v10 = vpop.f32.mrf.mxu0 }
  0xfe   :  { %164 = vst [vmem:[#allocation7] sm:$0xff] %v155_v10 }
  0xff   :  { %v220_v11 = vpop.f32.mrf.mxu0 }
 0x101   :  { %v158_v12 = vpop.f32.mrf.mxu0 }
 0x102   :  { %165 = vst [vmem:[#allocation7 + $0x8] sm:$0xff] %v158_v12 }
 0x103   :  { %v221_v13 = vpop.f32.mrf.mxu0 }
 0x104   :  { %291 = shalt.err (!%p288_p0)
}
 0x105   :  { %s313_s22 = smov 128   ;;  %s314_s23 = smov 8  }
 0x106   :  { %177 = dma.vmem_to_hbm [thread:$0]  %s172_s1, 256, %s341_s2, [#allocation4], %s313_s22, %s313_s22, %s314_s23  }
 0x107   :  { %304 = dma.done.wait [#allocation4], 256  }
 0x108   :  { %305 = vsyncadd [#allocation4], 4294967040 }
 0x109   :  { %181 = vsyncpa [#allocation3], 1 }
 0x10a   :  { %182 = vsyncpa [#allocation6], 1 }
 0x10b   :  { %183 = vsyncpa [#allocation4], 1 }

</bundles_post_ra>
